<compile_context>
chip_gen: v5e
topology: v5e:2x2
jax: 0.10.0
libtpu: 0.0.40
codegen_flags: <defaults>
</compile_context>

<pallas_src>
import jax
import jax.numpy as jnp
from jax.experimental import pallas as pl
from jax.experimental.pallas import tpu as pltpu

Q = 2                   # constructor-time constant of ValueModel (baked in)
DEFAULT_TILE_B = 32768  # batch rows per grid step (lane axis); ~1 MiB bf16 x tile


def _round_up(n, m):
    return ((n + m - 1) // m) * m


def value_model_kernel(x_ref, w1t_ref, b1_ref, w2_ref, o_ref):
    # x_ref:   (F, TILE_B) bf16   streamed batch tile, batch on the lane axis
    # w1t_ref: (H, F)      bf16   first-layer weights, transposed (resident)
    # b1_ref:  (H, 1)      f32    effective bias column = b1 + GMoment * W1[F]
    # w2_ref:  (H, 1)      f32    second-layer weights as a column (resident)
    # o_ref:   (1, TILE_B) f32    lane-dense output tile
    h = jnp.dot(w1t_ref[...], x_ref[...],
                preferred_element_type=jnp.float32)          # (H, TILE_B) f32, MXU
    h = jnp.maximum(h + b1_ref[...], 0.0)                    # bias + ReLU (VPU, f32)
    # H -> 1 layer: VPU multiply + sublane reduce; lane-dense (1, TILE_B) result.
    o_ref[...] = jnp.sum(h * w2_ref[...], axis=0, keepdims=True)


def value_model_forward(x, w1, b1, w2, b2, *, tile_b=DEFAULT_TILE_B):
    """x: (B, F) f32; w1: (F+1, H); b1: (H,); w2: (H, 1); b2: (1,)."""
    B, F = x.shape
    H = w1.shape[1]
    if F < 3:
        raise ValueError("ValueModel reads feature column 2 (x[:, 2:3]); need F >= 3")
    assert w1.shape[0] == F + 1, "w1 must have F+1 rows (raw features + moment column)"

    x = x.astype(jnp.float32)

    # GMoment is a global mean over the whole (un-padded) batch: compute it
    # wrapper-side and fold it into an effective first-layer bias.
    g = jnp.mean(x[:, 2] ** Q)                                          # scalar
    b1_eff = (b1.astype(jnp.float32)
              + g * w1[F, :].astype(jnp.float32)).reshape(H, 1)         # (H, 1)
    w1t = jnp.transpose(w1[:F, :]).astype(jnp.bfloat16)                 # (H, F)
    w2_col = w2.astype(jnp.float32).reshape(H, 1)                       # (H, 1)

    # Batch on the lane axis: transpose fused with the bf16 cast (single pass).
    x_t = jnp.transpose(x).astype(jnp.bfloat16)                         # (F, B)

    # ---- batch tile selection (lane dim => multiples of 128) ----------------
    tile_b = max(128, (int(tile_b) // 128) * 128)
    # Cap so large batches split into >= 2 tiles (v7x: 2 TCs on the parallel axis).
    half = _round_up(max(1, (B + 1) // 2), 128)
    tile_b = min(tile_b, half)
    num_tiles = pl.cdiv(B, tile_b)
    # Rebalance tiles to minimize tail padding while staying lane-aligned.
    tile_b = _round_up(pl.cdiv(B, num_tiles), 128)
    b_pad = num_tiles * tile_b
    if b_pad != B:
        # Zero-padded columns produce finite junk outputs sliced off below; g was
        # computed from the un-padded batch, so the moment is unaffected.
        x_t = jnp.pad(x_t, ((0, 0), (0, b_pad - B)))

    out = pl.pallas_call(
        value_model_kernel,
        out_shape=jax.ShapeDtypeStruct((num_tiles, tile_b), jnp.float32),
        grid_spec=pltpu.PrefetchScalarGridSpec(
            num_scalar_prefetch=0,
            grid=(num_tiles,),
            in_specs=[
                # x: streamed per batch tile (auto double-buffered DMA), lane-dense.
                pl.BlockSpec((F, tile_b), lambda i: (0, i)),
                # Weights / biases: constant index_maps -> fetched once, VMEM-resident.
                pl.BlockSpec((H, F), lambda i: (0, 0)),
                pl.BlockSpec((H, 1), lambda i: (0, 0)),
                pl.BlockSpec((H, 1), lambda i: (0, 0)),
            ],
            # Lane-dense output: last dim == tile_b.
            out_specs=pl.BlockSpec((1, tile_b), lambda i: (i, 0)),
        ),
        compiler_params=pltpu.CompilerParams(
            dimension_semantics=("parallel",),      # independent batch tiles
            vmem_limit_bytes=48 * 1024 * 1024,      # headroom for large dense tiles
        ),
    )(x_t, w1t, b1_eff, w2_col)

    # Flatten (num_tiles, tile_b) -> (b_pad,), drop padding, add b2 wrapper-side.
    return out.reshape(-1)[:B, None] + b2.astype(jnp.float32).reshape(1, 1)


def reference_forward(x, w1, b1, w2, b2):
    """Pure-JAX f32 reference matching the PyTorch forward semantics exactly."""
    B = x.shape[0]
    k = x[:, 2:3]
    g = jnp.mean(k ** Q).reshape(1, 1)                 # GMoment -> (1, 1)
    g = jnp.broadcast_to(g, (B, 1))                    # .expand(B, 1)
    inp = jnp.concatenate([x, g], axis=1)              # (B, F+1)
    h = jnp.maximum(inp @ w1 + b1, 0.0)
    return h @ w2 + b2


def reference_forward_quantized(x, w1, b1, w2, b2):
    """Reference with the kernel's numerics (bf16 x / W1 operands, f32 accumulate)."""
    F = x.shape[1]
    g = jnp.mean(x[:, 2] ** Q)
    b1_eff = b1 + g * w1[F, :]
    h = jnp.dot(x.astype(jnp.bfloat16), w1[:F, :].astype(jnp.bfloat16),
                preferred_element_type=jnp.float32) + b1_eff
    h = jnp.maximum(h, 0.0)
    return jnp.sum(h * w2.reshape(1, -1), axis=-1, keepdims=True) + b2.reshape(1, 1)


if __name__ == "__main__":
    B, F, H = 8, 16, 32

    key = jax.random.PRNGKey(0)
    kx, kw1, kb1, kw2, kb2 = jax.random.split(key, 5)
    x = jax.random.normal(kx, (B, F), dtype=jnp.float32)
    w1 = jax.random.normal(kw1, (F + 1, H), dtype=jnp.float32) * 0.1
    b1 = jax.random.normal(kb1, (H,), dtype=jnp.float32) * 0.1
    w2 = jax.random.normal(kw2, (H, 1), dtype=jnp.float32) * 0.1
    b2 = jax.random.normal(kb2, (1,), dtype=jnp.float32) * 0.1

    out = jax.block_until_ready(value_model_forward(x, w1, b1, w2, b2))
    assert out.shape == (B, 1)
    assert jnp.allclose(out, reference_forward_quantized(x, w1, b1, w2, b2),
                        atol=1e-4, rtol=1e-4), "mismatch vs bf16-quantized reference"
    assert jnp.allclose(out, reference_forward(x, w1, b1, w2, b2),
                        atol=5e-2, rtol=5e-2), "mismatch vs f32 reference"

    # Multi-tile path (grid over batch, lane padding, resident weights, tail slice).
    B2 = 300
    x2 = jax.random.normal(jax.random.PRNGKey(1), (B2, F), dtype=jnp.float32)
    out2 = jax.block_until_ready(value_model_forward(x2, w1, b1, w2, b2, tile_b=128))
    assert out2.shape == (B2, 1)
    assert jnp.allclose(out2, reference_forward_quantized(x2, w1, b1, w2, b2),
                        atol=1e-4, rtol=1e-4), "multi-tile mismatch vs quantized reference"
    assert jnp.allclose(out2, reference_forward(x2, w1, b1, w2, b2),
                        atol=5e-2, rtol=5e-2), "multi-tile mismatch vs f32 reference"

    print("KERNEL_OK")
</pallas_src>

<mosaic_0001>
module attributes {stable_mosaic.version = 11 : i64} {
  func.func @value_model_kernel(%arg0: i32, %arg1: memref<16x128xbf16, #tpu.memory_space<vmem>>, %arg2: memref<32x16xbf16, #tpu.memory_space<vmem>>, %arg3: memref<32x1xf32, #tpu.memory_space<vmem>>, %arg4: memref<32x1xf32, #tpu.memory_space<vmem>>, %arg5: memref<1x128xf32, #tpu.memory_space<vmem>>) attributes {dimension_semantics = [#tpu.dimension_semantics<parallel>], iteration_bounds = array<i64: 1>, scalar_prefetch = 0 : i64, scratch_operands = 0 : i64, tpu.core_type = #tpu.core_type<tc>, window_params = [{transform_indices = @transform_0, window_bounds = array<i64: 16, 128>}, {pipeline_mode = #tpu.pipeline_mode<synchronous>, transform_indices = @transform_1, window_bounds = array<i64: 32, 16>}, {pipeline_mode = #tpu.pipeline_mode<synchronous>, transform_indices = @transform_2, window_bounds = array<i64: 32, 1>}, {pipeline_mode = #tpu.pipeline_mode<synchronous>, transform_indices = @transform_3, window_bounds = array<i64: 32, 1>}, {transform_indices = @transform_4, window_bounds = array<i64: 1, 128>}]} {
    %c0 = arith.constant 0 : index
    %c0_0 = arith.constant 0 : index
    %0 = vector.load %arg2[%c0, %c0_0] : memref<32x16xbf16, #tpu.memory_space<vmem>>, vector<32x16xbf16>
    %c0_1 = arith.constant 0 : index
    %c0_2 = arith.constant 0 : index
    %1 = vector.load %arg1[%c0_1, %c0_2] : memref<16x128xbf16, #tpu.memory_space<vmem>>, vector<16x128xbf16>
    %cst = arith.constant dense<0.000000e+00> : vector<32x128xf32>
    %2 = tpu.matmul %0, %1, %cst {dimension_numbers = #tpu.dot_dimension_numbers<[1], [0], [0], [1], [0, 0, 1, 1], [], []>} : vector<32x16xbf16>, vector<16x128xbf16>, vector<32x128xf32> -> vector<32x128xf32>
    %c0_3 = arith.constant 0 : index
    %c0_4 = arith.constant 0 : index
    %3 = vector.load %arg3[%c0_3, %c0_4] : memref<32x1xf32, #tpu.memory_space<vmem>>, vector<32x1xf32>
    %4 = vector.broadcast %3 : vector<32x1xf32> to vector<32x128xf32>
    %5 = arith.addf %2, %4 : vector<32x128xf32>
    %cst_5 = arith.constant 0.000000e+00 : f32
    %6 = vector.broadcast %cst_5 : f32 to vector<32x128xf32>
    %7 = arith.maximumf %5, %6 : vector<32x128xf32>
    %c0_6 = arith.constant 0 : index
    %c0_7 = arith.constant 0 : index
    %8 = vector.load %arg4[%c0_6, %c0_7] : memref<32x1xf32, #tpu.memory_space<vmem>>, vector<32x1xf32>
    %9 = vector.broadcast %8 : vector<32x1xf32> to vector<32x128xf32>
    %10 = arith.mulf %7, %9 : vector<32x128xf32>
    %cst_8 = arith.constant dense<0.000000e+00> : vector<128xf32>
    %11 = vector.multi_reduction <add>, %10, %cst_8 [0] : vector<32x128xf32> to vector<128xf32>
    %12 = vector.shape_cast %11 : vector<128xf32> to vector<1x128xf32>
    %c0_9 = arith.constant 0 : index
    %c0_10 = arith.constant 0 : index
    %13 = vector.load %arg5[%c0_9, %c0_10] : memref<1x128xf32, #tpu.memory_space<vmem>>, vector<1x128xf32>
    tpu.vector_store %arg5[%c0_9, %c0_10], %12 {strides = array<i32>} : memref<1x128xf32, #tpu.memory_space<vmem>>, vector<1x128xf32>,
    return
  }
  func.func @transform_0(%arg0: i32) -> (i32, i32) {
    %c0_i32 = arith.constant 0 : i32
    %c0_i32_0 = arith.constant 0 : i32
    return %c0_i32, %arg0 : i32, i32
  }
  func.func @transform_1(%arg0: i32) -> (i32, i32) {
    %c0_i32 = arith.constant 0 : i32
    %c0_i32_0 = arith.constant 0 : i32
    %c0_i32_1 = arith.constant 0 : i32
    return %c0_i32, %c0_i32_0 : i32, i32
  }
  func.func @transform_2(%arg0: i32) -> (i32, i32) {
    %c0_i32 = arith.constant 0 : i32
    %c0_i32_0 = arith.constant 0 : i32
    %c0_i32_1 = arith.constant 0 : i32
    return %c0_i32, %c0_i32_0 : i32, i32
  }
  func.func @transform_3(%arg0: i32) -> (i32, i32) {
    %c0_i32 = arith.constant 0 : i32
    %c0_i32_0 = arith.constant 0 : i32
    %c0_i32_1 = arith.constant 0 : i32
    return %c0_i32, %c0_i32_0 : i32, i32
  }
  func.func @transform_4(%arg0: i32) -> (i32, i32) {
    %c0_i32 = arith.constant 0 : i32
    %c0_i32_0 = arith.constant 0 : i32
    return %arg0, %c0_i32 : i32, i32
  }
}

</mosaic_0001>

<bundles_post_ra>
// kernel: tpu_custom_call.1
= control target key start
LH: loop header
LB: loop body
LE: loop exit
PB: predicated region body
PF: predicated region fallthrough
CT: control target
= control target key end

     0   :  { %v198_v3 = vmov 0   ;;  %vm65_vm0 = vcmask 130048   ;;  %s261_s0 = inlined_call_operand.vmem [shape: bf16[16,128], index: 0, kind: input, shape index: {}]   ;;  %s262_s1 = inlined_call_operand.vmem [shape: bf16[32,16], index: 1, kind: input, shape index: {}]   ;;  %s263_s2 = inlined_call_operand.vmem [shape: f32[32,1], index: 2, kind: input, shape index: {}]   ;;  %s264_s3 = inlined_call_operand.vmem [shape: f32[32,1], index: 3, kind: input, shape index: {}]   ;;  %s265_s4 = inlined_call_operand.hbm [shape: f32[1,128], index: 4, kind: output, shape index: {}]  }
   0x1   :  { %v27_v0 = vld [vmem:[%s263_s2 + $0x10] sm:$0xff]  ;;  %v25_v1 = vld [vmem:[%s263_s2] sm:$0xff]  ;;  %170 = vset.pattern.permute.xlu1 %v198_v3  ;;  %169 = vset.pattern.permute.xlu0 %v198_v3  ;;  %v164_v5 = vld [vmem:[%s262_s1 + $0x8] sm:$0xff] }
   0x2   :  { %v165_v2 = vld [vmem:[%s261_s0] sm:$0xff]  ;;  %41 = vperm.xlu1 %170, %v27_v0   ;;  %31 = vperm.xlu0 %169, %v25_v1  }
   0x3   :  { %v163_v4 = vld [vmem:[%s262_s1] sm:$0xff]  ;;  %79 = vmatpush.bf16.msra.mxu0 %v165_v2  ;;  %166 = vmatpush.bf16.msra.mxu1 %v165_v2 }
   0x4   :  { %v95_v6 = vld [vmem:[%s264_s3] sm:$0xff] }
   0x5   :  { %9 = vsyncpa [#allocation3], 0  ;;  %171 = vset.pattern.permute.xlu2 %v198_v3  ;;  %v28_v7 = vld [vmem:[%s263_s2 + $0x18] sm:$0xff]  ;;  %v26_v8 = vld [vmem:[%s263_s2 + $0x8] sm:$0xff]  ;;  %s199_s2 = smov [#allocation2]   ;;  %s140_s11 = sshll.u32 %s265_s4, 4  ;;  %s141_s11 = int_to_ptr.hbm [resolvable:$true] %s140_s11 }
   0x6   :  { %101 = vperm.xlu2 %171, %v95_v6   ;;  %161 = vmatmul.msk.bf16.vlgmr.msra.gmra.mxu0 %vm65_vm0, %v163_v4  ;;  %v96_v9 = vld [vmem:[%s264_s3 + $0x8] sm:$0xff]  ;;  %v98_v10 = vld [vmem:[%s264_s3 + $0x18] sm:$0xff]  ;;  %v97_v11 = vld [vmem:[%s264_s3 + $0x10] sm:$0xff]  ;;  %s138_s3 = sshll.u32 %s199_s2, 4  ;;  %s139_s3 = int_to_ptr.vmem [resolvable:$true] %s138_s3 }
   0x7   :  { %162 = vmatmul.msk.bf16.vlgmr.msra.gmra.mxu1 %vm65_vm0, %v164_v5 }
   0xa   :  { %46 = vperm.xlu1 %170, %v28_v7   ;;  %36 = vperm.xlu0 %169, %v26_v8  }
   0xe   :  { %106 = vperm.xlu2 %171, %v96_v9  }
  0x12   :  { %116 = vperm.xlu1 %170, %v98_v10   ;;  %111 = vperm.xlu0 %169, %v97_v11  }
  0x60   :  { %v102_v16 = vpop.permute.xlu2 %101 }
  0x68   :  { %v107_v28 = vpop.permute.xlu2 %106 }
  0x74   :  { %v32_v12 = vpop.permute.xlu0 %31  ;;  %v42_v13 = vpop.permute.xlu1 %41 }
  0x7c   :  { %v37_v17 = vpop.permute.xlu0 %36  ;;  %v47_v19 = vpop.permute.xlu1 %46 }
  0x83   :  { %v81_v14 = vpop.f32.mrf.mxu0 }
  0x84   :  { %v86_v15 = vpop.f32.mrf.mxu1  ;;  %v82_v18 = vadd.f32 %v81_v14, %v32_v12  ;;  %v112_v32 = vpop.permute.xlu0 %111 }
  0x85   :  { %v87_v20 = vadd.f32 %v86_v15, %v42_v13  ;;  %v117_v35 = vpop.permute.xlu1 %116 }
  0x86   :  { %v91_v23 = vmax.f32 %v82_v18, 0.0 }
  0x87   :  { %v93_v26 = vmax.f32 %v87_v20, 0.0 }
  0x88   :  { %v119_v29 = vmul.f32 %v102_v16, %v91_v23 }
  0x89   :  { %v121_v33 = vmul.f32 %v112_v32, %v93_v26 }
  0x8b   :  { %v83_v21 = vpop.f32.mrf.mxu0 }
  0x8c   :  { %v88_v22 = vpop.f32.mrf.mxu1  ;;  %v84_v24 = vadd.f32 %v83_v21, %v37_v17 }
  0x8d   :  { %v89_v25 = vadd.f32 %v88_v22, %v47_v19 }
  0x8e   :  { %v92_v27 = vmax.f32 %v84_v24, 0.0 }
  0x8f   :  { %v94_v31 = vmax.f32 %v89_v25, 0.0 }
  0x90   :  { %v120_v30 = vmul.f32 %v107_v28, %v92_v27 }
  0x91   :  { %v122_v36 = vmul.f32 %v117_v35, %v94_v31 }
  0x92   :  { %v123_v34 = vadd.f32 %v120_v30, %v119_v29 }
  0x94   :  { %v124_v37 = vadd.f32 %v123_v34, %v121_v33 }
  0x96   :  { %v125_v38 = vadd.f32 %v124_v37, %v122_v36 }
  0x98   :  { %v126_v39 = vrot.slane %v125_v38, 4 }
  0x9a   :  { %v127_v40 = vadd.f32 %v126_v39, %v125_v38 }
  0x9c   :  { %v128_v41 = vrot.slane %v127_v40, 2 }
  0x9e   :  { %v129_v42 = vadd.f32 %v128_v41, %v127_v40 }
  0xa0   :  { %v130_v43 = vrot.slane %v129_v42, 1 }
  0xa2   :  { %v131_v44 = vadd.f32 %v130_v43, %v129_v42 }
  0xa4   :  { %132 = vst [vmem:[#allocation2] sm:$0x1] %v131_v44 }
  0xa5   :  { %143 = dma.vmem_to_hbm [thread:$0]  %s139_s3, 16, %s141_s11, [#allocation3]  }
  0xa6   :  { %196 = dma.done.wait [#allocation3], 16  }
  0xa7   :  { %197 = vsyncadd [#allocation3], 4294967280 }
  0xa8   :  { %148 = vsyncpa [#allocation3], 1 }

</bundles_post_ra>
